<compile_context>
chip_gen: v5e
topology: v5e:2x2
jax: 0.10.0
libtpu: 0.0.40
codegen_flags: <defaults>
</compile_context>

<pallas_src>
import jax
import jax.numpy as jnp
from jax.experimental import pallas as pl
from jax.experimental.pallas import tpu as pltpu


# ---------------------------------------------------------------------------
# output_size == 1: VPU dot-product kernel with lane-dense output.
# ---------------------------------------------------------------------------
def _logreg_vpu_kernel(xt_ref, w_ref, b_ref, o_ref):
    # xt_ref: (F, TB) f32  -- batch on lanes, features on sublanes
    # w_ref : (F, 1)  f32  -- weight column, broadcast across lanes (VPU)
    # b_ref : (1, 1)  f32  -- bias scalar in SMEM (scalar path, free)
    # o_ref : (1, TB)      -- lane-dense output row (unmasked vst)
    prod = xt_ref[...] * w_ref[...]                      # VPU multiply, (F, TB)
    z = jnp.sum(prod, axis=0, keepdims=True)             # XLU sublane reduce -> (1, TB)
    z = z + b_ref[0, 0]                                  # scalar bias from SMEM
    o_ref[...] = jax.nn.sigmoid(z).astype(o_ref.dtype)   # EUP exp, f32 math


def _logreg_vpu(x, w_col, bias, *, block_batch):
    B, F = x.shape
    tb = max(128, (int(block_batch) // 128) * 128)       # lane-dense tile width
    b_pad = pl.cdiv(B, tb) * tb

    # Layout plumbing: batch -> lane axis. Makes the O=1 reduction a sublane
    # reduce and the output store lane-dense; also gives TB*4-byte DMA chunks
    # (vs F*4-byte chunks row-major) since F << TB for logistic regression.
    xt = x.T                                             # (F, B), one XLA transpose
    if b_pad != B:
        xt = jnp.pad(xt, ((0, 0), (0, b_pad - B)))       # padded cols sliced off below
    b2d = bias.reshape(1, 1).astype(jnp.float32)

    cost = pl.CostEstimate(
        flops=2 * B * F + 4 * B,
        transcendentals=B,
        bytes_accessed=4 * (B * F + F + 1 + B),
    )

    out = pl.pallas_call(
        _logreg_vpu_kernel,
        out_shape=jax.ShapeDtypeStruct((1, b_pad), x.dtype),
        grid=(b_pad // tb,),
        in_specs=[
            pl.BlockSpec((F, tb), lambda i: (0, i)),                # x^T tile
            pl.BlockSpec((F, 1), lambda i: (0, 0)),                 # weight column (resident)
            pl.BlockSpec(memory_space=pltpu.MemorySpace.SMEM),      # bias scalar
        ],
        out_specs=pl.BlockSpec((1, tb), lambda i: (0, i)),
        compiler_params=pltpu.CompilerParams(
            dimension_semantics=("parallel",)),                     # megacore on v7x
        cost_estimate=cost,
    )(xt, w_col, b2d)

    return out[0, :B].reshape(B, 1)


# ---------------------------------------------------------------------------
# output_size > 1: batch-tiled GEMM on the MXU.
# ---------------------------------------------------------------------------
def _logreg_mxu_kernel(x_ref, w_ref, b_ref, o_ref):
    # x_ref: (TB, F), w_ref: (F, O), b_ref: (1, O), o_ref: (TB, O)
    z = jnp.dot(x_ref[...], w_ref[...], preferred_element_type=jnp.float32)
    z = z + b_ref[...]                                   # f32 epilogue (v5e-friendly)
    o_ref[...] = jax.nn.sigmoid(z).astype(o_ref.dtype)


def _logreg_mxu(x, w_fo, bias, *, block_batch):
    B, F = x.shape
    O = w_fo.shape[1]
    tb = max(8, (int(block_batch) // 8) * 8)
    b_pad = pl.cdiv(B, tb) * tb
    if b_pad != B:
        x = jnp.pad(x, ((0, b_pad - B), (0, 0)))
    b2d = bias.reshape(1, O)

    cost = pl.CostEstimate(
        flops=2 * B * F * O + 4 * B * O,
        transcendentals=B * O,
        bytes_accessed=4 * (B * F + F * O + O + B * O),
    )

    # TODO(synk): for very large F add a K-tiled "arbitrary" reduction axis with a
    # pl.when(k==0) accumulator init, and cast x/w to bf16 for the v6e/v7x MXU.
    out = pl.pallas_call(
        _logreg_mxu_kernel,
        out_shape=jax.ShapeDtypeStruct((b_pad, O), x.dtype),
        grid=(b_pad // tb,),
        in_specs=[
            pl.BlockSpec((tb, F), lambda i: (i, 0)),     # batch tile of x
            pl.BlockSpec((F, O), lambda i: (0, 0)),      # weights resident in VMEM
            pl.BlockSpec((1, O), lambda i: (0, 0)),      # bias row
        ],
        out_specs=pl.BlockSpec((tb, O), lambda i: (i, 0)),
        compiler_params=pltpu.CompilerParams(
            dimension_semantics=("parallel",)),
        cost_estimate=cost,
    )(x, w_fo, b2d)

    return out[:B]


# ---------------------------------------------------------------------------
# Public wrapper: same semantics as LogisticRegression.forward.
# ---------------------------------------------------------------------------
def logistic_regression(x, weight, bias, *, block_batch=256):
    """sigmoid(x @ weight.T + bias).

    x:      [B, F] float32
    weight: [O, F] float32 (torch nn.Linear layout)
    bias:   [O]    float32
    returns [B, O] float32
    """
    O = weight.shape[0]
    if O == 1:
        return _logreg_vpu(x, weight.T, bias, block_batch=block_batch)
    return _logreg_mxu(x, weight.T, bias, block_batch=block_batch)


if __name__ == "__main__":
    # ---- output_size = 1 (module default): VPU dot-product path --------------
    batch, input_size, output_size = 512, 32, 1
    kx, kw, kb = jax.random.split(jax.random.PRNGKey(0), 3)
    bound = 1.0 / (input_size ** 0.5)
    x = jax.random.normal(kx, (batch, input_size), dtype=jnp.float32)
    w = jax.random.uniform(kw, (output_size, input_size),
                           minval=-bound, maxval=bound, dtype=jnp.float32)
    b = jax.random.uniform(kb, (output_size,),
                           minval=-bound, maxval=bound, dtype=jnp.float32)

    out = jax.block_until_ready(logistic_regression(x, w, b))
    ref = jax.nn.sigmoid(
        jnp.matmul(x, w.T, precision=jax.lax.Precision.HIGHEST) + b)
    assert out.shape == (batch, output_size)
    assert jnp.allclose(out, ref, atol=1e-5, rtol=1e-5), \
        float(jnp.max(jnp.abs(out - ref)))

    # Unaligned batch exercises the padding path (same kernel, grid of 1).
    out_u = jax.block_until_ready(logistic_regression(x[:200], w, b))
    assert out_u.shape == (200, 1)
    assert jnp.allclose(out_u, ref[:200], atol=1e-5, rtol=1e-5)

    # ---- output_size > 1: batch-tiled MXU GEMM path ---------------------------
    B2, F2, O2 = 256, 256, 128
    kx2, kw2, kb2 = jax.random.split(jax.random.PRNGKey(1), 3)
    bound2 = 1.0 / (F2 ** 0.5)
    x2 = jax.random.normal(kx2, (B2, F2), dtype=jnp.float32)
    w2 = jax.random.uniform(kw2, (O2, F2), minval=-bound2, maxval=bound2,
                            dtype=jnp.float32)
    b2 = jax.random.uniform(kb2, (O2,), minval=-bound2, maxval=bound2,
                            dtype=jnp.float32)
    out2 = jax.block_until_ready(logistic_regression(x2, w2, b2))
    ref2 = jax.nn.sigmoid(
        jnp.matmul(x2, w2.T, precision=jax.lax.Precision.HIGHEST) + b2)
    assert out2.shape == (B2, O2)
    # MXU default f32 precision may differ slightly from the HIGHEST reference.
    assert jnp.allclose(out2, ref2, atol=5e-3, rtol=5e-3)

    print("KERNEL_OK")
</pallas_src>

<mosaic_0001>
module attributes {stable_mosaic.version = 11 : i64} {
  func.func @_logreg_vpu_kernel(%arg0: i32, %arg1: memref<32x256xf32, #tpu.memory_space<vmem>>, %arg2: memref<32x1xf32, #tpu.memory_space<vmem>>, %arg3: memref<1x1xf32, #tpu.memory_space<smem>>, %arg4: memref<1x256xf32, #tpu.memory_space<vmem>>) attributes {dimension_semantics = [#tpu.dimension_semantics<parallel>], iteration_bounds = array<i64: 2>, scalar_prefetch = 0 : i64, scratch_operands = 0 : i64, tpu.core_type = #tpu.core_type<tc>, window_params = [{transform_indices = @transform_0, window_bounds = array<i64: 32, 256>}, {pipeline_mode = #tpu.pipeline_mode<synchronous>, transform_indices = @transform_1, window_bounds = array<i64: 32, 1>}, {transform_indices = @transform_2, window_bounds = array<i64: 1, 1>}, {transform_indices = @transform_3, window_bounds = array<i64: 1, 256>}]} {
    %c0 = arith.constant 0 : index
    %c0_0 = arith.constant 0 : index
    %0 = vector.load %arg1[%c0, %c0_0] : memref<32x256xf32, #tpu.memory_space<vmem>>, vector<32x256xf32>
    %c0_1 = arith.constant 0 : index
    %c0_2 = arith.constant 0 : index
    %1 = vector.load %arg2[%c0_1, %c0_2] : memref<32x1xf32, #tpu.memory_space<vmem>>, vector<32x1xf32>
    %2 = vector.broadcast %1 : vector<32x1xf32> to vector<32x256xf32>
    %3 = arith.mulf %0, %2 : vector<32x256xf32>
    %cst = arith.constant dense<0.000000e+00> : vector<256xf32>
    %4 = vector.multi_reduction <add>, %3, %cst [0] : vector<32x256xf32> to vector<256xf32>
    %5 = vector.shape_cast %4 : vector<256xf32> to vector<1x256xf32>
    %c0_3 = arith.constant 0 : index
    %c0_4 = arith.constant 0 : index
    %6 = memref.load %arg3[%c0_3, %c0_4] : memref<1x1xf32, #tpu.memory_space<smem>>
    %7 = vector.broadcast %6 : f32 to vector<1x256xf32>
    %8 = arith.addf %5, %7 : vector<1x256xf32>
    %9 = arith.negf %8 : vector<1x256xf32>
    %10 = math.exp %9 : vector<1x256xf32>
    %cst_5 = arith.constant 1.000000e+00 : f32
    %11 = vector.broadcast %cst_5 : f32 to vector<1x256xf32>
    %12 = arith.addf %11, %10 : vector<1x256xf32>
    %13 = arith.divf %11, %12 : vector<1x256xf32>
    %c0_6 = arith.constant 0 : index
    %c0_7 = arith.constant 0 : index
    %14 = vector.load %arg4[%c0_6, %c0_7] : memref<1x256xf32, #tpu.memory_space<vmem>>, vector<1x256xf32>
    tpu.vector_store %arg4[%c0_6, %c0_7], %13 {strides = array<i32>} : memref<1x256xf32, #tpu.memory_space<vmem>>, vector<1x256xf32>,
    return
  }
  func.func @transform_0(%arg0: i32) -> (i32, i32) {
    %c0_i32 = arith.constant 0 : i32
    %c0_i32_0 = arith.constant 0 : i32
    return %c0_i32, %arg0 : i32, i32
  }
  func.func @transform_1(%arg0: i32) -> (i32, i32) {
    %c0_i32 = arith.constant 0 : i32
    %c0_i32_0 = arith.constant 0 : i32
    %c0_i32_1 = arith.constant 0 : i32
    return %c0_i32, %c0_i32_0 : i32, i32
  }
  func.func @transform_2(%arg0: i32) -> (i32, i32) {
    %c0_i32 = arith.constant 0 : i32
    %c0_i32_0 = arith.constant 0 : i32
    %c0_i32_1 = arith.constant 0 : i32
    return %c0_i32, %c0_i32_0 : i32, i32
  }
  func.func @transform_3(%arg0: i32) -> (i32, i32) {
    %c0_i32 = arith.constant 0 : i32
    %c0_i32_0 = arith.constant 0 : i32
    return %c0_i32, %arg0 : i32, i32
  }
}

</mosaic_0001>

<bundles_post_ra>
// kernel: tpu_custom_call.1
= control target key start
LH: loop header
LB: loop body
LE: loop exit
PB: predicated region body
PF: predicated region fallthrough
CT: control target
= control target key end

     0   :  { %s736_s0 = inlined_call_operand.hbm [shape: f32[32,512], index: 0, kind: input, shape index: {}]   ;;  %s737_s1 = inlined_call_operand.vmem [shape: f32[32,1], index: 1, kind: input, shape index: {}]   ;;  %s738_s2 = inlined_call_operand.<no memory space> [shape: f32[1,1], index: 2, kind: input, shape index: {}]   ;;  %s739_s3 = inlined_call_operand.hbm [shape: f32[1,512], index: 3, kind: output, shape index: {}]  }
   0x1   :  { %8 = sst [smem:[#allocation2]] %s738_s2 }
   0x2   :  { %9 = vsyncpa [#allocation4], 0 }
   0x3   :  { %11 = vsyncpa [#allocation4 + $0x1], 0 }
   0x4   :  { %12 = vsyncpa [#allocation5], 0 }
   0x5   :  { %14 = vsyncpa [#allocation5 + $0x1], 0  ;;  %s592_s14 = smov 0   ;;  %s594_s15 = smov 0  }
   0x6   :  { %s596_s16 = smov 0   ;;  %s598_s17 = smov 0  }
   0x7 LB: > { %s613_s2 = sadd.s32 4294967295, %s563_s17   ;;  %s391_s18 = sadd.s32 4294967294, %s563_s17   ;;  %s563_s17 = sphi %s598_s17, %s750_s17   ;;  %s559_s16 = sphi %s596_s16, %s749_s16   ;;  %s555_s15 = sphi %s594_s15, %s748_s15   ;;  %s551_s14 = sphi %s592_s14, %s747_s14  }
   0x8   : > { %s617_s19 = sadd.s32 1, %s563_s17   ;;  %s27_s20 = sadd.s32 1, %s559_s16 }
   0x9   : > { %s24_s21 = ssub.s32 %s563_s17, %s617_s19  ;;  %p34_p0 = scmp.ne.s32.totalorder %s559_s16, %s555_s15 }
   0xa   : > { %p25_p1 = scmp.eq.s32.totalorder %s24_s21, 0  ;;  %p35_p2 = scmp.eq.s32.totalorder %s563_s17, 0 }
   0xb   : > { %p40_p3 = scmp.ne.s32.totalorder %s555_s15, %s551_s14  ;;  %p41_p4 = scmp.eq.s32.totalorder %s613_s2, 0 }
   0xc   : > { %s629_s22 = scalar_select %p25_p1, %s559_s16, %s27_s20  }
   0xd   : > { %p631_p5 = por %p35_p2, %p34_p0  ;;  %p635_p6 = por %p41_p4, %p40_p3 }
   0xe   : > { %p106_p7 = scmp.eq.s32.totalorder %s613_s2, 1  ;;  %p112_p8 = scmp.eq.s32.totalorder %s391_s18, 1 }
   0xf   : > { %p393_p9 = scmp.ge.s32.totalorder %s563_s17, 2  ;;  %p419_p10 = scmp.lt.s32.totalorder %s563_s17, 2 }
  0x10   : > { %p642_p11 = por %p106_p7, %p34_p0  ;;  %p646_p12 = por %p112_p8, %p40_p3 }
  0x11   : > { %s138_s27 = sand.u32 1, %s559_s16   ;;  %s406_s28 = sshll.u32 %s563_s17, 4 }
  0x12   : > { %s394_s29 = sshll.u32 %s138_s27, 6  ;;  %s147_s5 = scalar_lea.hbm %s736_s0, %s406_s28 }
  0x13   : > { %s148_s6 = sshll.u32 %s147_s5, 4  ;;  %s142_s7 = scalar_lea.vmem [#allocation3], %s394_s29  ;;  %s149_s6 = int_to_ptr.hbm [resolvable:$true] %s148_s6 }
  0x14   : > { %s150_s8 = sshll.u32 %s142_s7, 4  ;;  %p657_p13 = pnand %p419_p10, %p631_p5  ;;  %s151_s8 = int_to_ptr.vmem [resolvable:$true] %s150_s8 }
  0x15   : > { %p397_p0 = scmp.ge.s32.totalorder %s563_s17, 1  ;;  %s139_s10 = scalar_lea.sflag [#allocation4], %s138_s27 }
  0x16   : > { %s467_s11 = sshra.s32 %s149_s6, 4  ;;  %p471_p2 = pneg %p657_p13  ;;  %s468_s11 = int_to_ptr.hbm [resolvable:$true] %s467_s11 }
  0x17   : > { %s469_s12 = scalar_lea.hbm %s468_s11, 64  ;;  %s474_s20 = scalar_lea.hbm %s736_s0, 128 }
  0x18   : > { %p470_p1 = scmp.ne.s32.totalorder %s468_s11, %s469_s12  ;;  %p475_p5 = scmp.lt.s32.totalorder %s468_s11, %s736_s0 }
  0x19   : > { %p476_p7 = scmp.lt.s32.totalorder %s474_s20, %s469_s12 }
  0x1a   : > { %p472_p3 = pnand %p471_p2, %p470_p1 }
  0x1b   : > { %p477_p8 = por %p476_p7, %p475_p5 }
  0x1c   : > { %p473_p4 = pneg %p472_p3 }
  0x1e   : > { %p478_p10 = pnand %p477_p8, %p473_p4 }
  0x20   : > { %481 = shalt.err (!%p478_p10)
}
  0x21   : > { %s565_s27 = smov 512   ;;  %s566_s28 = smov 256  }
  0x22   : > { %s567_s29 = smov 16   ;;  %p158_p1 = scmp.lt.s32.totalorder %s563_s17, 3 }
  0x23   : > { %414 = dma.hbm_to_vmem [thread:$0]  (!%p657_p13), %s149_s6, 1024, %s151_s8, %s139_s10, %s565_s27, %s566_s28, %s567_s29  }
  0x24   : > { %p159_p2 = pnand %p397_p0, %p158_p1 }
  0x25   : > { %s676_s30 = sand.u32 (!%p159_p2), 1, %s555_s15  }
  0x26   : > { %162 = sbr.rel (%p159_p2) target bundleno = 226 (0xe2), region = 32  ;;  %s398_s4 = sshll.u32 (!%p159_p2), %s676_s30, 6 }
  0x27   : > { %s165_s5 = scalar_lea.sflag (!%p159_p2), [#allocation4], %s676_s30  ;;  %s168_s7 = scalar_lea.vmem (!%p159_p2), [#allocation3], %s398_s4 }
  0x2b   : > { %542 = dma.done.wait (%p635_p6), %s165_s5, 1024  }
  0x2c   : > { %544 = vsyncadd (%p635_p6), %s165_s5, 4294966272  ;;  %v568_v0 = vmov 0   ;;  %v204_v1 = vld [vmem:[%s737_s1 + $0x10] sm:$0xff]  ;;  %v202_v2 = vld [vmem:[%s737_s1] sm:$0xff]  ;;  %s252_s18 = sld [smem:[#allocation2]]  ;;  %s399_s20 = sshll.u32 %s676_s30, 1 }
  0x2d   : > { %458 = vset.pattern.permute.xlu1 %v568_v0  ;;  %457 = vset.pattern.permute.xlu0 %v568_v0  ;;  %v205_v3 = vld [vmem:[%s737_s1 + $0x18] sm:$0xff]  ;;  %v203_v4 = vld [vmem:[%s737_s1 + $0x8] sm:$0xff]  ;;  %v194_v7 = vld [vmem:[%s168_s7] sm:$0xff]  ;;  %s403_s21 = sshll.u32 %s613_s2, 1  ;;  %s191_s2 = scalar_lea.vmem [#allocation6], %s399_s20  ;;  %vm297_vm7 = vcmask 1040384  }
  0x2e   : > { %218 = vperm.xlu1 %458, %v204_v1   ;;  %208 = vperm.xlu0 %457, %v202_v2   ;;  %v195_v8 = vld [vmem:[%s168_s7 + $0x8] sm:$0xff]  ;;  %v196_v9 = vld [vmem:[%s168_s7 + $0x10] sm:$0xff]  ;;  %v197_v10 = vld [vmem:[%s168_s7 + $0x18] sm:$0xff]  ;;  %s316_s28 = scalar_lea.hbm %s739_s3, %s403_s21  ;;  %s318_s29 = sshll.u32 %s191_s2, 4  ;;  %s319_s29 = int_to_ptr.vmem [resolvable:$true] %s318_s29 }
  0x2f   : > { %v198_v11 = vld [vmem:[%s168_s7 + $0x20] sm:$0xff]  ;;  %v199_v12 = vld [vmem:[%s168_s7 + $0x28] sm:$0xff]  ;;  %v200_v19 = vld [vmem:[%s168_s7 + $0x30] sm:$0xff]  ;;  %s320_s4 = sshll.u32 %s316_s28, 4  ;;  %s306_s5 = scalar_lea.sflag [#allocation5], %s676_s30  ;;  %s321_s4 = int_to_ptr.hbm [resolvable:$true] %s320_s4 }
  0x30   : > { %v201_v20 = vld [vmem:[%s168_s7 + $0x38] sm:$0xff]  ;;  %s511_s7 = sshra.s32 %s321_s4, 4  ;;  %s517_s10 = scalar_lea.hbm %s739_s3, 4  ;;  %s512_s7 = int_to_ptr.hbm [resolvable:$true] %s511_s7 }
  0x31   : > { %s513_s6 = scalar_lea.hbm %s512_s7, 2  ;;  %p518_p3 = scmp.lt.s32.totalorder %s512_s7, %s739_s3 }
  0x32   : > { %v253_v41 = vstv %s252_s18  ;;  %p514_p6 = scmp.ne.s32.totalorder %s512_s7, %s513_s6  ;;  %p519_p4 = scmp.lt.s32.totalorder %s517_s10, %s513_s6 }
  0x34   : > { %p515_p13 = pnand %p514_p6, %p642_p11  ;;  %p520_p5 = por %p519_p4, %p518_p3 }
  0x36   : > { %223 = vperm.xlu1 %458, %v205_v3   ;;  %213 = vperm.xlu0 %457, %v203_v4   ;;  %v300_v3 = vlaneseq  ;;  %p516_p0 = pneg %p515_p13 }
  0x38   : > { %vm302_vm9 = vcmp.lt.s32.totalorder %v300_v3, 256  ;;  %p521_p7 = pnand %p520_p5, %p516_p0 }
  0xa0   : > { %v219_v5 = vpop.permute.xlu1 %218  ;;  %v209_v6 = vpop.permute.xlu0 %208 }
  0xa1   : > { %v226_v14 = vmul.f32 %v209_v6, %v194_v7  ;;  %v227_v15 = vmul.f32 %v209_v6, %v195_v8  ;;  %v230_v21 = vmul.f32 %v219_v5, %v198_v11  ;;  %v231_v22 = vmul.f32 %v219_v5, %v199_v12 }
  0xa8   : > { %v214_v13 = vpop.permute.xlu0 %213  ;;  %v224_v18 = vpop.permute.xlu1 %223 }
  0xa9   : > { %v228_v16 = vmul.f32 %v214_v13, %v196_v9  ;;  %v229_v17 = vmul.f32 %v214_v13, %v197_v10  ;;  %v232_v25 = vmul.f32 %v224_v18, %v200_v19  ;;  %v233_v26 = vmul.f32 %v224_v18, %v201_v20 }
  0xab   : > { %v234_v23 = vadd.f32 %v228_v16, %v226_v14  ;;  %v243_v24 = vadd.f32 %v229_v17, %v227_v15 }
  0xad   : > { %v235_v27 = vadd.f32 %v234_v23, %v230_v21  ;;  %v244_v28 = vadd.f32 %v243_v24, %v231_v22 }
  0xaf   : > { %v236_v29 = vadd.f32 %v235_v27, %v232_v25  ;;  %v245_v30 = vadd.f32 %v244_v28, %v233_v26 }
  0xb1   : > { %v237_v31 = vrot.slane %v236_v29, 4  ;;  %v246_v32 = vrot.slane %v245_v30, 4 }
  0xb3   : > { %v238_v33 = vadd.f32 %v237_v31, %v236_v29  ;;  %v247_v34 = vadd.f32 %v246_v32, %v245_v30 }
  0xb5   : > { %v239_v35 = vrot.slane %v238_v33, 2  ;;  %v248_v36 = vrot.slane %v247_v34, 2 }
  0xb7   : > { %v240_v37 = vadd.f32 %v239_v35, %v238_v33  ;;  %v249_v38 = vadd.f32 %v248_v36, %v247_v34 }
  0xb9   : > { %v241_v39 = vrot.slane %v240_v37, 1  ;;  %v250_v40 = vrot.slane %v249_v38, 1 }
  0xbb   : > { %v242_v42 = vadd.f32 %v241_v39, %v240_v37  ;;  %v251_v43 = vadd.f32 %v250_v40, %v249_v38 }
  0xbd   : > { %v254_v44 = vadd.f32 %v253_v41, %v242_v42  ;;  %v255_v45 = vadd.f32 %v253_v41, %v251_v43 }
  0xbf   : > { %v400_v46 = vmul.f32 -1.442695, %v254_v44  ;;  %v401_v47 = vmul.f32 -1.442695, %v255_v45 }
  0xc1   : > { %459 = vpow2.f32 %v400_v46 }
  0xc2   : > { %461 = vpow2.f32 %v401_v47 }
  0xc7   : > { %v460_v48 = vpop.eup %459 }
  0xc8   : > { %v462_v49 = vpop.eup %461  ;;  %v262_v50 = vadd.f32 1.0, %v460_v48 }
  0xc9   : > { %v263_v51 = vadd.f32 1.0, %v462_v49 }
  0xca   : > { %463 = vrcp.f32 %v262_v50  ;;  %vm269_vm2 = vweird.f32 %v262_v50  ;;  %v275_v63 = vand.u32 2147483648, %v262_v50  ;;  %v273_v1 = vand.u32 2147483647, %v262_v50 }
  0xcb   : > { %465 = vrcp.f32 %v263_v51  ;;  %v290_v59 = vand.u32 2147483648, %v263_v51  ;;  %v288_v61 = vand.u32 2147483647, %v263_v51  ;;  %vm284_vm4 = vweird.f32 %v263_v51 }
  0xcc   : > { %v276_v7 = vor.u32 1.1754944e-38, %v275_v63  ;;  %vm274_vm8 = vcmp.eq.f32.partialorder %v273_v1, 8.507059e+37 }
  0xcd   : > { %v291_v4 = vor.u32 1.1754944e-38, %v290_v59  ;;  %vm289_vm6 = vcmp.eq.f32.partialorder %v288_v61, 8.507059e+37 }
  0xd0   : > { %v464_v52 = vpop.eup %463 }
  0xd1   : > { %v466_v53 = vpop.eup %465  ;;  %v265_v54 = vmul.f32 %v464_v52, %v262_v50  ;;  %vm270_vm0 = vweird.f32 %v464_v52 }
  0xd2   : > { %v280_v55 = vmul.f32 %v466_v53, %v263_v51  ;;  %vm285_vm1 = vweird.f32 %v466_v53  ;;  %vm701_vm3 = vmor %vm269_vm2, %vm270_vm0 }
  0xd3   : > { %v266_v56 = vsub.f32 1.0, %v265_v54  ;;  %vm286_vm5 = vmor %vm284_vm4, %vm285_vm1 }
  0xd4   : > { %v281_v57 = vsub.f32 1.0, %v280_v55 }
  0xd5   : > { %v267_v58 = vmul.f32 %v464_v52, %v266_v56 }
  0xd6   : > { %v282_v60 = vmul.f32 %v466_v53, %v281_v57 }
  0xd7   : > { %v268_v62 = vadd.f32 %v464_v52, %v267_v58 }
  0xd8   : > { %v283_v2 = vadd.f32 %v466_v53, %v282_v60 }
  0xd9   : > { %v272_v5 = vsel %vm701_vm3, %v464_v52, %v268_v62 }
  0xda   : > { %v287_v6 = vsel %vm286_vm5, %v466_v53, %v283_v2  ;;  %v277_v10 = vsel %vm274_vm8, %v276_v7, %v272_v5 }
  0xdb   : > { %v292_v8 = vsel %vm289_vm6, %v291_v4, %v287_v6 }
  0xdc   : > { %v296_v9 = vrot.slane %v292_v8, 7 }
  0xde   : > { %v298_v11 = vsel %vm297_vm7, %v277_v10, %v296_v9 }
  0xdf   : > { %304 = vst.msk [vmem:[%s191_s2] sm:$0x3] %vm302_vm9, %v298_v11 }
  0xe0   : > { %524 = shalt.err (!%p521_p7)
}
  0xe1   : > { %409 = dma.vmem_to_hbm [thread:$0]  (%p642_p11), %s319_s29, 32, %s321_s4, %s306_s5  }
  0xe2 PF: > { %s332_s30 = sand.u32 1, %s551_s14   ;;  %p416_p8 = pnand %p393_p9, %p646_p12 }
  0xe3   : > { %s333_s13 = scalar_lea.sflag [#allocation5], %s332_s30 }
  0xe4   : > { %p417_p10 = pneg %p416_p8 }
  0xe6   : > { %546 = dma.done.wait (%p417_p10), %s333_s13, 32  }
  0xe7   : > { %548 = vsyncadd (%p417_p10), %s333_s13, 4294967264  ;;  %p17_p1 = scmp.ge.s32.totalorder %s617_s19, 4   ;;  %s747_s14 = smov %s555_s15 }
  0xe8   : > { %s748_s15 = smov %s559_s16  ;;  %s749_s16 = smov %s629_s22 }
  0xe9   : > { %s750_s17 = smov %s617_s19  ;;  %19 = sbr.rel (!%p17_p1) target bundleno = 7 (0x7), region = 77 }
  0xee   :  { %339 = vsyncpa [#allocation4], 1 }
  0xef   :  { %341 = vsyncpa [#allocation4 + $0x1], 1 }
  0xf0   :  { %342 = vsyncpa [#allocation5], 1 }
  0xf1   :  { %344 = vsyncpa [#allocation5 + $0x1], 1 }

</bundles_post_ra>
